<compile_context>
chip_gen: v5e
topology: v5e:2x2
jax: 0.10.0
libtpu: 0.0.40
codegen_flags: <defaults>
</compile_context>

<pallas_src>
import functools

import jax
import jax.numpy as jnp
from jax.experimental import pallas as pl
from jax.experimental.pallas import tpu as pltpu

_INV_SQRT2 = 0.7071067811865476


def _round_up(x, m):
    return (x + m - 1) // m * m


def _cdiv(a, b):
    return (a + b - 1) // b


def _vmem_budget_bytes():
    """~85% of the local chip's physical VMEM (128 MiB v5e/v6e, 64 MiB v7x)."""
    try:
        cap = int(pltpu.get_tpu_info().vmem_capacity_bytes)
    except Exception:
        cap = 64 * 2**20
    return int(cap * 0.85)


def _gelu_exact(x):
    # torch.nn.GELU default: 0.5 * x * (1 + erf(x / sqrt(2))), computed in f32.
    return 0.5 * x * (1.0 + jax.lax.erf(x * _INV_SQRT2))


# ----------------------------------------------------------------------------
# Kernels
# ----------------------------------------------------------------------------
def _head_kernel_resident(x_ref, w1_ref, b1_ref, w2_ref, b2_ref, o_ref):
    # x: (TB, Hp)  w1: (Hp, Hp)  b1: (1, Hp)  w2: (Hp, Lp)  b2: (1, Lp)
    x = x_ref[...].astype(w1_ref.dtype)          # feed the MXU in weight dtype
    h = jnp.dot(x, w1_ref[...], preferred_element_type=jnp.float32)
    h = _gelu_exact(h + b1_ref[...])             # bias + GELU in f32
    h = h.astype(w2_ref.dtype)
    out = jnp.dot(h, w2_ref[...], preferred_element_type=jnp.float32)
    o_ref[...] = (out + b2_ref[...]).astype(o_ref.dtype)


def _head_kernel_ktiled(x_ref, w1_ref, b1_ref, w2_ref, b2_ref, o_ref, acc_ref):
    # x: (TB, TK)  w1: (TK, Hp)  acc: (TB, Hp) f32   grid = (batch, k)
    k = pl.program_id(1)

    @pl.when(k == 0)
    def _():
        acc_ref[...] = jnp.zeros_like(acc_ref)

    x = x_ref[...].astype(w1_ref.dtype)
    acc_ref[...] += jnp.dot(x, w1_ref[...], preferred_element_type=jnp.float32)

    @pl.when(k == pl.num_programs(1) - 1)
    def _():
        h = _gelu_exact(acc_ref[...] + b1_ref[...])
        h = h.astype(w2_ref.dtype)
        out = jnp.dot(h, w2_ref[...], preferred_element_type=jnp.float32)
        o_ref[...] = (out + b2_ref[...]).astype(o_ref.dtype)


# ----------------------------------------------------------------------------
# Wrappers
# ----------------------------------------------------------------------------
def prepare_head_params(w1, b1, w2, b2, *, compute_dtype=None):
    """Pad/cast the weights ONCE, outside the hot call.

    w1: (H, H), w2: (H, L) stored as (in_features, out_features).
    H is zero-padded to a multiple of 128, L to at least 128 (lane-dense
    stores); padded rows/cols are zero so valid outputs are unchanged.
    compute_dtype (e.g. jnp.bfloat16) optionally casts the weights so the
    dots run at the MXU's native bf16 rate (f32 accumulation is kept).
    """
    H = w1.shape[0]
    L = w2.shape[1]
    Hp = _round_up(H, 128)
    Lp = _round_up(max(L, 128), 128)
    wdt = compute_dtype if compute_dtype is not None else w1.dtype
    w1p = jnp.pad(w1.astype(wdt), ((0, Hp - H), (0, Hp - H)))
    w2p = jnp.pad(w2.astype(wdt), ((0, Hp - H), (0, Lp - L)))
    b1p = jnp.pad(b1.astype(jnp.float32), (0, Hp - H)).reshape(1, Hp)
    b2p = jnp.pad(b2.astype(jnp.float32), (0, Lp - L)).reshape(1, Lp)
    return w1p, b1p, w2p, b2p


@functools.partial(
    jax.jit,
    static_argnames=("n_labels", "block_b", "block_k", "force_k_tiled"),
)
def classification_head(x, w1p, b1p, w2p, b2p, *, n_labels, block_b=512,
                        block_k=512, force_k_tiled=False):
    """Eval-mode ClassificationHead forward. x: (B, H) -> (B, n_labels)."""
    # TODO(synk): training-mode dropout (p=0.1) not implemented (eval identity).
    B, H = x.shape
    Hp = w1p.shape[0]
    Lp = w2p.shape[1]

    act_bytes = jnp.dtype(x.dtype).itemsize
    w_bytes = jnp.dtype(w1p.dtype).itemsize
    sub = 16 if x.dtype == jnp.bfloat16 else 8

    # Only pad x along the contraction dim when H % 128 != 0 (matches the
    # padded weights). Realistic hidden sizes skip this HBM copy entirely.
    if Hp != H:
        x = jnp.pad(x, ((0, 0), (0, Hp - H)))

    budget = _vmem_budget_bytes()

    # ---- batch tiling: balanced, sublane-aligned tiles; >=2 grid steps when
    # possible so v7x can shard the batch axis across its 2 TensorCores. -----
    nb = max(1, _cdiv(B, block_b))
    if nb == 1 and B >= 2 * sub:
        nb = 2
    TB = _round_up(_cdiv(B, nb), sub)

    weights_bytes = (Hp * Hp + Hp * Lp) * w_bytes + (Hp + Lp) * 4  # Buffered(1)

    def resident_footprint(tb):
        return (weights_bytes
                + 2 * tb * Hp * act_bytes      # x tile, double-buffered
                + 2 * tb * Lp * act_bytes      # out tile, double-buffered
                + tb * Hp * 4 + tb * Lp * 4)   # f32 intermediates

    while resident_footprint(TB) > budget and TB > sub:
        TB = max(sub, _round_up(TB // 2, sub))
    if TB >= B:
        TB = B                                  # single full-extent batch tile
    grid_b = _cdiv(B, TB)

    use_ktiled = force_k_tiled or resident_footprint(TB) > budget

    cost = pl.CostEstimate(
        flops=2 * B * Hp * Hp + 2 * B * Hp * Lp,
        transcendentals=B * Hp,
        bytes_accessed=(B * Hp * act_bytes                 # x (read once)
                        + (Hp * Hp + Hp * Lp) * w_bytes    # resident weights
                        + (Hp + Lp) * 4                    # biases
                        + B * Lp * act_bytes),             # output
    )

    if not use_ktiled:
        grid_spec = pltpu.PrefetchScalarGridSpec(
            num_scalar_prefetch=0,
            grid=(grid_b,),
            in_specs=[
                pl.BlockSpec((TB, Hp), lambda i: (i, 0)),      # x (pipelined)
                pl.BlockSpec((Hp, Hp), lambda i: (0, 0),
                             pipeline_mode=pl.Buffered(1)),    # w1 resident
                pl.BlockSpec((1, Hp), lambda i: (0, 0),
                             pipeline_mode=pl.Buffered(1)),    # b1 resident
                pl.BlockSpec((Hp, Lp), lambda i: (0, 0),
                             pipeline_mode=pl.Buffered(1)),    # w2 resident
                pl.BlockSpec((1, Lp), lambda i: (0, 0),
                             pipeline_mode=pl.Buffered(1)),    # b2 resident
            ],
            out_specs=pl.BlockSpec((TB, Lp), lambda i: (i, 0)),
        )
        kernel = _head_kernel_resident
        dims = ("parallel",)
    else:
        # K-tiled fallback: weights don't fit VMEM (e.g. large H on v7x).
        TK = max(128, (min(block_k, Hp) // 128) * 128)
        while Hp % TK != 0:
            TK -= 128

        def ktiled_footprint(tb, tk):
            return (2 * tk * Hp * w_bytes          # w1 K-slab, double-buffered
                    + Hp * Lp * w_bytes            # w2 resident
                    + (Hp + Lp) * 4
                    + 2 * tb * tk * act_bytes      # x tile
                    + 2 * tb * Lp * act_bytes      # out tile
                    + tb * Hp * 4 + tb * Lp * 4)   # acc + epilogue tmp

        while ktiled_footprint(TB, TK) > budget and TK > 128:
            TK = max(128, TK - 128)
            while Hp % TK != 0:
                TK -= 128
        nk = Hp // TK

        grid_spec = pltpu.PrefetchScalarGridSpec(
            num_scalar_prefetch=0,
            grid=(grid_b, nk),
            in_specs=[
                pl.BlockSpec((TB, TK), lambda i, k: (i, k)),   # x
                pl.BlockSpec((TK, Hp), lambda i, k: (k, 0)),   # w1 K-slab
                pl.BlockSpec((1, Hp), lambda i, k: (0, 0),
                             pipeline_mode=pl.Buffered(1)),    # b1
                pl.BlockSpec((Hp, Lp), lambda i, k: (0, 0),
                             pipeline_mode=pl.Buffered(1)),    # w2
                pl.BlockSpec((1, Lp), lambda i, k: (0, 0),
                             pipeline_mode=pl.Buffered(1)),    # b2
            ],
            out_specs=pl.BlockSpec((TB, Lp), lambda i, k: (i, 0)),
            scratch_shapes=[pltpu.VMEM((TB, Hp), jnp.float32)],
        )
        kernel = _head_kernel_ktiled
        dims = ("parallel", "arbitrary")

    out = pl.pallas_call(
        kernel,
        out_shape=jax.ShapeDtypeStruct((B, Lp), x.dtype),
        grid_spec=grid_spec,
        compiler_params=pltpu.CompilerParams(
            dimension_semantics=dims,
            vmem_limit_bytes=budget,
        ),
        cost_estimate=cost,
    )(x, w1p, b1p, w2p, b2p)

    return out[:, :n_labels] if Lp != n_labels else out


# ----------------------------------------------------------------------------
# Reference + demo
# ----------------------------------------------------------------------------
def _reference(x, w1, b1, w2, b2):
    h = x.astype(jnp.float32) @ w1.astype(jnp.float32) + b1.astype(jnp.float32)
    h = _gelu_exact(h)
    out = h @ w2.astype(jnp.float32) + b2.astype(jnp.float32)
    return out.astype(x.dtype)


def _make_inputs(batch, hidden, labels, dtype=jnp.float32):
    k_x, k_w1, k_b1, k_w2, k_b2 = jax.random.split(jax.random.PRNGKey(0), 5)
    bound = 1.0 / (hidden ** 0.5)   # torch Linear-style uniform init
    x = jax.random.normal(k_x, (batch, hidden), dtype=dtype)
    w1 = jax.random.uniform(k_w1, (hidden, hidden), minval=-bound, maxval=bound,
                            dtype=dtype)
    b1 = jax.random.uniform(k_b1, (hidden,), minval=-bound, maxval=bound,
                            dtype=dtype)
    w2 = jax.random.uniform(k_w2, (hidden, labels), minval=-bound, maxval=bound,
                            dtype=dtype)
    b2 = jax.random.uniform(k_b2, (labels,), minval=-bound, maxval=bound,
                            dtype=dtype)
    return x, w1, b1, w2, b2


if __name__ == "__main__":
    # 1) Main path (weights VMEM-resident), small shapes matching the module.
    batch, hidden, labels = 8, 32, 4
    x, w1, b1, w2, b2 = _make_inputs(batch, hidden, labels)
    params = prepare_head_params(w1, b1, w2, b2)
    out = classification_head(x, *params, n_labels=labels)
    out = jax.block_until_ready(out)
    ref = _reference(x, w1, b1, w2, b2)
    assert out.shape == (batch, labels), out.shape
    assert jnp.allclose(out, ref, atol=1e-4, rtol=1e-4), \
        float(jnp.max(jnp.abs(out - ref)))

    # 2) K-tiled fallback path (forced), exercises accumulate + epilogue.
    x2, w1_2, b1_2, w2_2, b2_2 = _make_inputs(16, 256, labels)
    params2 = prepare_head_params(w1_2, b1_2, w2_2, b2_2)
    out2 = classification_head(x2, *params2, n_labels=labels,
                               force_k_tiled=True, block_k=128)
    out2 = jax.block_until_ready(out2)
    ref2 = _reference(x2, w1_2, b1_2, w2_2, b2_2)
    assert out2.shape == (16, labels), out2.shape
    assert jnp.allclose(out2, ref2, atol=1e-4, rtol=1e-4), \
        float(jnp.max(jnp.abs(out2 - ref2)))

    # 3) Optional bf16 matmul dtype (f32 accumulation), loose tolerance.
    params_bf16 = prepare_head_params(w1, b1, w2, b2,
                                      compute_dtype=jnp.bfloat16)
    out3 = classification_head(x, *params_bf16, n_labels=labels)
    out3 = jax.block_until_ready(out3)
    assert out3.shape == (batch, labels), out3.shape
    assert jnp.allclose(out3, ref, atol=1e-1, rtol=1e-1), \
        float(jnp.max(jnp.abs(out3 - ref)))

    print("KERNEL_OK")
</pallas_src>

<mosaic_0001>
module attributes {stable_mosaic.version = 11 : i64} {
  func.func @_head_kernel_resident(%arg0: i32, %arg1: memref<8x128xf32, #tpu.memory_space<vmem>>, %arg2: memref<128x128xf32, #tpu.memory_space<vmem>>, %arg3: memref<1x128xf32, #tpu.memory_space<vmem>>, %arg4: memref<128x128xf32, #tpu.memory_space<vmem>>, %arg5: memref<1x128xf32, #tpu.memory_space<vmem>>, %arg6: memref<8x128xf32, #tpu.memory_space<vmem>>) attributes {dimension_semantics = [#tpu.dimension_semantics<parallel>], iteration_bounds = array<i64: 1>, scalar_prefetch = 0 : i64, scratch_operands = 0 : i64, tpu.core_type = #tpu.core_type<tc>, window_params = [{transform_indices = @transform_0, window_bounds = array<i64: 8, 128>}, {pipeline_mode = #tpu.pipeline_mode<synchronous>, transform_indices = @transform_1, window_bounds = array<i64: 128, 128>}, {pipeline_mode = #tpu.pipeline_mode<synchronous>, transform_indices = @transform_2, window_bounds = array<i64: 1, 128>}, {pipeline_mode = #tpu.pipeline_mode<synchronous>, transform_indices = @transform_3, window_bounds = array<i64: 128, 128>}, {pipeline_mode = #tpu.pipeline_mode<synchronous>, transform_indices = @transform_4, window_bounds = array<i64: 1, 128>}, {transform_indices = @transform_5, window_bounds = array<i64: 8, 128>}]} {
    %c0 = arith.constant 0 : index
    %c0_0 = arith.constant 0 : index
    %0 = vector.load %arg1[%c0, %c0_0] : memref<8x128xf32, #tpu.memory_space<vmem>>, vector<8x128xf32>
    %c0_1 = arith.constant 0 : index
    %c0_2 = arith.constant 0 : index
    %1 = vector.load %arg2[%c0_1, %c0_2] : memref<128x128xf32, #tpu.memory_space<vmem>>, vector<128x128xf32>
    %cst = arith.constant dense<0.000000e+00> : vector<8x128xf32>
    %2 = tpu.matmul %0, %1, %cst {dimension_numbers = #tpu.dot_dimension_numbers<[1], [0], [0], [1], [0, 0, 1, 1], [], []>} : vector<8x128xf32>, vector<128x128xf32>, vector<8x128xf32> -> vector<8x128xf32>
    %c0_3 = arith.constant 0 : index
    %c0_4 = arith.constant 0 : index
    %3 = vector.load %arg3[%c0_3, %c0_4] : memref<1x128xf32, #tpu.memory_space<vmem>>, vector<1x128xf32>
    %4 = vector.broadcast %3 : vector<1x128xf32> to vector<8x128xf32>
    %5 = arith.addf %2, %4 : vector<8x128xf32>
    %cst_5 = arith.constant 5.000000e-01 : f32
    %6 = vector.broadcast %cst_5 : f32 to vector<8x128xf32>
    %7 = arith.mulf %6, %5 : vector<8x128xf32>
    %cst_6 = arith.constant 0.707106769 : f32
    %8 = vector.broadcast %cst_6 : f32 to vector<8x128xf32>
    %9 = arith.mulf %5, %8 : vector<8x128xf32>
    %10 = math.erf %9 : vector<8x128xf32>
    %cst_7 = arith.constant 1.000000e+00 : f32
    %11 = vector.broadcast %cst_7 : f32 to vector<8x128xf32>
    %12 = arith.addf %11, %10 : vector<8x128xf32>
    %13 = arith.mulf %7, %12 : vector<8x128xf32>
    %c0_8 = arith.constant 0 : index
    %c0_9 = arith.constant 0 : index
    %14 = vector.load %arg4[%c0_8, %c0_9] : memref<128x128xf32, #tpu.memory_space<vmem>>, vector<128x128xf32>
    %cst_10 = arith.constant dense<0.000000e+00> : vector<8x128xf32>
    %15 = tpu.matmul %13, %14, %cst_10 {dimension_numbers = #tpu.dot_dimension_numbers<[1], [0], [0], [1], [0, 0, 1, 1], [], []>} : vector<8x128xf32>, vector<128x128xf32>, vector<8x128xf32> -> vector<8x128xf32>
    %c0_11 = arith.constant 0 : index
    %c0_12 = arith.constant 0 : index
    %16 = vector.load %arg5[%c0_11, %c0_12] : memref<1x128xf32, #tpu.memory_space<vmem>>, vector<1x128xf32>
    %17 = vector.broadcast %16 : vector<1x128xf32> to vector<8x128xf32>
    %18 = arith.addf %15, %17 : vector<8x128xf32>
    %c0_13 = arith.constant 0 : index
    %c0_14 = arith.constant 0 : index
    %19 = vector.load %arg6[%c0_13, %c0_14] : memref<8x128xf32, #tpu.memory_space<vmem>>, vector<8x128xf32>
    tpu.vector_store %arg6[%c0_13, %c0_14], %18 {strides = array<i32>} : memref<8x128xf32, #tpu.memory_space<vmem>>, vector<8x128xf32>,
    return
  }
  func.func @transform_0(%arg0: i32) -> (i32, i32) {
    %c0_i32 = arith.constant 0 : i32
    %c0_i32_0 = arith.constant 0 : i32
    return %arg0, %c0_i32 : i32, i32
  }
  func.func @transform_1(%arg0: i32) -> (i32, i32) {
    %c0_i32 = arith.constant 0 : i32
    %c0_i32_0 = arith.constant 0 : i32
    %c0_i32_1 = arith.constant 0 : i32
    return %c0_i32, %c0_i32_0 : i32, i32
  }
  func.func @transform_2(%arg0: i32) -> (i32, i32) {
    %c0_i32 = arith.constant 0 : i32
    %c0_i32_0 = arith.constant 0 : i32
    %c0_i32_1 = arith.constant 0 : i32
    return %c0_i32, %c0_i32_0 : i32, i32
  }
  func.func @transform_3(%arg0: i32) -> (i32, i32) {
    %c0_i32 = arith.constant 0 : i32
    %c0_i32_0 = arith.constant 0 : i32
    %c0_i32_1 = arith.constant 0 : i32
    return %c0_i32, %c0_i32_0 : i32, i32
  }
  func.func @transform_4(%arg0: i32) -> (i32, i32) {
    %c0_i32 = arith.constant 0 : i32
    %c0_i32_0 = arith.constant 0 : i32
    %c0_i32_1 = arith.constant 0 : i32
    return %c0_i32, %c0_i32_0 : i32, i32
  }
  func.func @transform_5(%arg0: i32) -> (i32, i32) {
    %c0_i32 = arith.constant 0 : i32
    %c0_i32_0 = arith.constant 0 : i32
    return %arg0, %c0_i32 : i32, i32
  }
}

</mosaic_0001>

<bundles_post_ra>
// kernel: classification_head.1
= control target key start
LH: loop header
LB: loop body
LE: loop exit
PB: predicated region body
PF: predicated region fallthrough
CT: control target
= control target key end

     0   :  { %10 = vsyncpa [#allocation3], 0  ;;  %s297_s0 = inlined_call_operand.vmem [shape: f32[8,128], index: 0, kind: input, shape index: {}]   ;;  %s298_s1 = inlined_call_operand.hbm [shape: f32[128,128], index: 1, kind: input, shape index: {}]   ;;  %s299_s2 = inlined_call_operand.vmem [shape: f32[1,128], index: 2, kind: input, shape index: {}]   ;;  %s300_s3 = inlined_call_operand.hbm [shape: f32[128,128], index: 3, kind: input, shape index: {}]   ;;  %s301_s4 = inlined_call_operand.vmem [shape: f32[1,128], index: 4, kind: input, shape index: {}]   ;;  %s302_s5 = inlined_call_operand.vmem [shape: f32[8,128], index: 5, kind: output, shape index: {}]  }
   0x1   :  { %s18_s20 = sshll.u32 %s298_s1, 4  ;;  %s19_s20 = int_to_ptr.hbm [resolvable:$true] %s18_s20 }
   0x2   :  { %11 = vsyncpa [#allocation5], 0  ;;  %s245_s21 = smov [#allocation2]   ;;  %s33_s25 = sshll.u32 %s300_s3, 4  ;;  %s34_s25 = int_to_ptr.hbm [resolvable:$true] %s33_s25 }
   0x3   :  { %s20_s22 = sshll.u32 %s245_s21, 4  ;;  %s246_s26 = smov 128   ;;  %s21_s22 = int_to_ptr.vmem [resolvable:$true] %s20_s22 }
   0x4   :  { %s247_s27 = smov 8   ;;  %s248_s28 = smov [#allocation4]  }
   0x5   :  { %26 = dma.hbm_to_vmem [thread:$0]  %s19_s20, 2048, %s21_s22, [#allocation3], %s246_s26, %s246_s26, %s247_s27  }
   0x6   :  { %s35_s29 = sshll.u32 %s248_s28, 4  ;;  %s36_s29 = int_to_ptr.vmem [resolvable:$true] %s35_s29 }
   0x7   :  { %41 = dma.hbm_to_vmem [thread:$0]  %s34_s25, 2048, %s36_s29, [#allocation5], %s246_s26, %s246_s26, %s247_s27  }
   0x8   :  { %241 = dma.done.wait [#allocation3], 2048  }
   0x9   :  { %242 = vsyncadd [#allocation3], 4294965248 }
   0xa   :  { %243 = dma.done.wait [#allocation5], 2048  }
   0xb   :  { %244 = vsyncadd [#allocation5], 4294965248  ;;  %v68_v0 = vld [vmem:[#allocation2 + $0x78] sm:$0xff]  ;;  %v67_v1 = vld [vmem:[#allocation2 + $0x70] sm:$0xff] }
   0xc   :  { %73 = vmatpush.msra.mxu0 %v68_v0  ;;  %v66_v2 = vld [vmem:[#allocation2 + $0x68] sm:$0xff]  ;;  %v65_v3 = vld [vmem:[#allocation2 + $0x60] sm:$0xff]  ;;  %v64_v4 = vld [vmem:[#allocation2 + $0x58] sm:$0xff] }
   0xd   :  { %v63_v5 = vld [vmem:[#allocation2 + $0x50] sm:$0xff]  ;;  %v62_v6 = vld [vmem:[#allocation2 + $0x48] sm:$0xff]  ;;  %v61_v7 = vld [vmem:[#allocation2 + $0x40] sm:$0xff] }
   0xe   :  { %74 = vmatpush.msra.mxu0 %v67_v1  ;;  %v60_v8 = vld [vmem:[#allocation2 + $0x38] sm:$0xff]  ;;  %v59_v9 = vld [vmem:[#allocation2 + $0x30] sm:$0xff]  ;;  %v58_v10 = vld [vmem:[#allocation2 + $0x28] sm:$0xff] }
   0xf   :  { %v57_v11 = vld [vmem:[#allocation2 + $0x20] sm:$0xff]  ;;  %v56_v12 = vld [vmem:[#allocation2 + $0x18] sm:$0xff]  ;;  %v55_v13 = vld [vmem:[#allocation2 + $0x10] sm:$0xff] }
  0x10   :  { %75 = vmatpush.msra.mxu0 %v66_v2  ;;  %v54_v14 = vld [vmem:[#allocation2 + $0x8] sm:$0xff]  ;;  %v53_v15 = vld [vmem:[#allocation2] sm:$0xff]  ;;  %v152_v17 = vld [vmem:[#allocation4 + $0x78] sm:$0xff] }
  0x11   :  { %v52_v16 = vld [vmem:[%s297_s0] sm:$0xff]  ;;  %157 = vmatpush.msra.mxu1 %v152_v17  ;;  %v151_v18 = vld [vmem:[#allocation4 + $0x70] sm:$0xff]  ;;  %v150_v19 = vld [vmem:[#allocation4 + $0x68] sm:$0xff] }
  0x12   :  { %76 = vmatpush.msra.mxu0 %v65_v3  ;;  %v149_v20 = vld [vmem:[#allocation4 + $0x60] sm:$0xff]  ;;  %v148_v22 = vld [vmem:[#allocation4 + $0x58] sm:$0xff]  ;;  %v147_v23 = vld [vmem:[#allocation4 + $0x50] sm:$0xff] }
  0x13   :  { %158 = vmatpush.msra.mxu1 %v151_v18  ;;  %v189_v21 = vld [vmem:[%s299_s2] ss:$0 sm:$0xff]  ;;  %v146_v25 = vld [vmem:[#allocation4 + $0x48] sm:$0xff]  ;;  %v144_v29 = vld [vmem:[#allocation4 + $0x38] sm:$0xff] }
  0x14   :  { %77 = vmatpush.msra.mxu0 %v64_v4  ;;  %v145_v27 = vld [vmem:[#allocation4 + $0x40] sm:$0xff]  ;;  %v143_v31 = vld [vmem:[#allocation4 + $0x30] sm:$0xff]  ;;  %v142_v33 = vld [vmem:[#allocation4 + $0x28] sm:$0xff] }
  0x15   :  { %159 = vmatpush.msra.mxu1 %v150_v19  ;;  %v141_v36 = vld [vmem:[#allocation4 + $0x20] sm:$0xff]  ;;  %v140_v39 = vld [vmem:[#allocation4 + $0x18] sm:$0xff]  ;;  %v139_v42 = vld [vmem:[#allocation4 + $0x10] sm:$0xff] }
  0x16   :  { %78 = vmatpush.msra.mxu0 %v63_v5  ;;  %v138_v45 = vld [vmem:[#allocation4 + $0x8] sm:$0xff]  ;;  %v137_v47 = vld [vmem:[#allocation4] sm:$0xff] }
  0x17   :  { %160 = vmatpush.msra.mxu1 %v149_v20 }
  0x18   :  { %79 = vmatpush.msra.mxu0 %v62_v6 }
  0x19   :  { %161 = vmatpush.msra.mxu1 %v148_v22 }
  0x1a   :  { %80 = vmatpush.msra.mxu0 %v61_v7 }
  0x1b   :  { %162 = vmatpush.msra.mxu1 %v147_v23 }
  0x1c   :  { %81 = vmatpush.msra.mxu0 %v60_v8 }
  0x1d   :  { %163 = vmatpush.msra.mxu1 %v146_v25 }
  0x1e   :  { %82 = vmatpush.msra.mxu0 %v59_v9 }
  0x1f   :  { %164 = vmatpush.msra.mxu1 %v145_v27 }
  0x20   :  { %83 = vmatpush.msra.mxu0 %v58_v10 }
  0x21   :  { %165 = vmatpush.msra.mxu1 %v144_v29 }
  0x22   :  { %84 = vmatpush.msra.mxu0 %v57_v11  ;;  %v190_v11 = vld [vmem:[%s301_s4] ss:$0 sm:$0xff] }
  0x23   :  { %166 = vmatpush.msra.mxu1 %v143_v31 }
  0x24   :  { %85 = vmatpush.msra.mxu0 %v56_v12 }
  0x25   :  { %167 = vmatpush.msra.mxu1 %v142_v33 }
  0x26   :  { %86 = vmatpush.msra.mxu0 %v55_v13 }
  0x27   :  { %168 = vmatpush.msra.mxu1 %v141_v36 }
  0x28   :  { %87 = vmatpush.msra.mxu0 %v54_v14 }
  0x29   :  { %169 = vmatpush.msra.mxu1 %v140_v39 }
  0x2a   :  { %88 = vmatpush.msra.mxu0 %v53_v15 }
  0x2b   :  { %89 = vmatmul.f32.vlgmr.msra.gmra.mxu0 %v52_v16  ;;  %170 = vmatpush.msra.mxu1 %v139_v42 }
  0x2d   :  { %171 = vmatpush.msra.mxu1 %v138_v45 }
  0x2f   :  { %172 = vmatpush.msra.mxu1 %v137_v47 }
  0xa8   :  { %v90_v24 = vpop.f32.mrf.mxu0 }
  0xa9   :  { %v91_v26 = vadd.f32 %v189_v21, %v90_v24 }
  0xab   :  { %v94_v28 = vmul.f32 0.70710677, %v91_v26  ;;  %v93_v8 = vmul.f32 0.5, %v91_v26 }
  0xad   :  { %v95_v30 = vmul.f32 %v94_v28, %v94_v28 }
  0xaf   :  { %v96_v32 = vmin.f32 %v95_v30, 16.0 }
  0xb1   :  { %v97_v34 = vmul.f32 2.1237322e-06, %v96_v32  ;;  %v108_v35 = vmul.f32 3.8918573e-05, %v96_v32 }
  0xb3   :  { %v98_v37 = vadd.f32 0.00028619796, %v97_v34  ;;  %v109_v38 = vadd.f32 0.001143296, %v108_v35 }
  0xb5   :  { %v99_v40 = vmul.f32 %v98_v37, %v96_v32  ;;  %v110_v41 = vmul.f32 %v109_v38, %v96_v32 }
  0xb7   :  { %v111_v43 = vadd.f32 0.014752088, %v110_v41  ;;  %v100_v44 = vadd.f32 0.0036580483, %v99_v40 }
  0xb9   :  { %v112_v46 = vmul.f32 %v111_v43, %v96_v32  ;;  %v101_v49 = vmul.f32 %v100_v44, %v96_v32 }
  0xbb   :  { %v113_v48 = vadd.f32 0.112945676, %v112_v46  ;;  %v102_v52 = vadd.f32 0.05243302, %v101_v49 }
  0xbd   :  { %v114_v50 = vmul.f32 %v113_v48, %v96_v32  ;;  %v103_v55 = vmul.f32 %v102_v52, %v96_v32 }
  0xbf   :  { %v115_v51 = vadd.f32 0.4994258, %v114_v50  ;;  %v104_v56 = vadd.f32 0.18741608, %v103_v55 }
  0xc1   :  { %v116_v53 = vmul.f32 %v115_v51, %v96_v32  ;;  %v105_v58 = vmul.f32 %v104_v56, %v96_v32 }
  0xc3   :  { %v117_v54 = vadd.f32 1.0, %v116_v53  ;;  %v106_v62 = vadd.f32 1.1283791, %v105_v58 }
  0xc5   :  { %191 = vrcp.f32 %v117_v54  ;;  %v129_v61 = vand.u32 2147483648, %v117_v54  ;;  %v127_v0 = vand.u32 2147483647, %v117_v54  ;;  %vm123_vm1 = vweird.f32 %v117_v54 }
  0xc6   :  { %v107_v3 = vmul.f32 %v106_v62, %v94_v28 }
  0xc7   :  { %v130_v2 = vor.u32 1.1754944e-38, %v129_v61  ;;  %vm128_vm3 = vcmp.eq.f32.partialorder %v127_v0, 8.507059e+37 }
  0xcb   :  { %v192_v57 = vpop.eup %191 }
  0xcc   :  { %v119_v59 = vmul.f32 %v192_v57, %v117_v54  ;;  %vm124_vm0 = vweird.f32 %v192_v57 }
  0xcd   :  { %vm125_vm2 = vmor %vm123_vm1, %vm124_vm0 }
  0xce   :  { %v120_v60 = vsub.f32 1.0, %v119_v59 }
  0xd0   :  { %v121_v63 = vmul.f32 %v192_v57, %v120_v60 }
  0xd2   :  { %v122_v1 = vadd.f32 %v192_v57, %v121_v63 }
  0xd4   :  { %v126_v4 = vsel %vm125_vm2, %v192_v57, %v122_v1 }
  0xd5   :  { %v131_v5 = vsel %vm128_vm3, %v130_v2, %v126_v4 }
  0xd6   :  { %v132_v6 = vmul.f32 %v131_v5, %v107_v3 }
  0xd8   :  { %v184_v7 = vclamps-f32 %v132_v6, 1.0 }
  0xda   :  { %v135_v9 = vadd.f32 1.0, %v184_v7 }
  0xdc   :  { %v136_v10 = vmul.f32 %v135_v9, %v93_v8 }
  0xde   :  { %173 = vmatmul.f32.vlgmr.msra.gmra.mxu1 %v136_v10 }
 0x15b   :  { %v174_v12 = vpop.f32.mrf.mxu1 }
 0x15c   :  { %v175_v13 = vadd.f32 %v190_v11, %v174_v12 }
 0x15e   :  { %177 = vst [vmem:[%s302_s5] sm:$0xff] %v175_v13 }
 0x15f   :  { %182 = vsyncpa [#allocation3], 1 }
 0x160   :  { %183 = vsyncpa [#allocation5], 1 }

</bundles_post_ra>
